<compile_context>
chip_gen: v5e
topology: v5e:2x2
jax: 0.10.0
libtpu: 0.0.40
codegen_flags: <defaults>
</compile_context>

<pallas_src>
import jax
import jax.numpy as jnp
from jax.experimental import pallas as pl
from jax.experimental.pallas import tpu as pltpu


_TARGET_STEP_BYTES = 2 << 20   # ~2 MiB of HBM traffic per grid step
_VMEM_BUDGET = 24 << 20        # double-buffered blocks stay under ~24 MiB


def _conv1x1_kernel_4d(x_ref, w_ref, b_ref, o_ref):
    # x_ref: VMEM (NB, C, RB, 128)   w_ref: SMEM (C,)   b_ref: SMEM (1,)
    # o_ref: VMEM (NB, 1, RB, 128)
    c_in = x_ref.shape[1]
    acc = x_ref[:, 0:1, :, :] * w_ref[0] + b_ref[0]   # bias folded into 1st FMA
    for c in range(1, c_in):                          # C is small & static (3)
        acc = acc + x_ref[:, c:c + 1, :, :] * w_ref[c]
    o_ref[...] = acc.astype(o_ref.dtype)


def _conv1x1_kernel_3d(x_ref, w_ref, b_ref, o_ref):
    # x_ref: VMEM (NB, C, TM)   w_ref: SMEM (C,)   b_ref: SMEM (1,)
    # o_ref: VMEM (NB, 1, TM)
    c_in = x_ref.shape[1]
    acc = x_ref[:, 0:1, :] * w_ref[0] + b_ref[0]
    for c in range(1, c_in):
        acc = acc + x_ref[:, c:c + 1, :] * w_ref[c]
    o_ref[...] = acc.astype(o_ref.dtype)


def conv1x1(x_nchw, weight, bias):
    """1x1 convolution, stride 1, no padding.

    x_nchw: (N, C, H, W) float32
    weight: (1, C, 1, 1) float32
    bias:   (1,) float32
    returns (N, 1, H, W) float32
    """
    N, C, H, W = x_nchw.shape
    HW = H * W
    dtype = x_nchw.dtype
    elt = 4  # float32 bytes

    w1d = weight.reshape(C)
    b1d = bias.reshape(1)

    cost = pl.CostEstimate(
        flops=2 * C * N * HW,
        transcendentals=0,
        bytes_accessed=elt * (N * C * HW + N * HW + C + 1),
    )
    cparams = pltpu.CompilerParams(
        dimension_semantics=("parallel", "parallel"))

    def pick_nb(block_elems_per_image):
        # block_elems_per_image = input + output elements touched per image.
        per_step = block_elems_per_image * elt
        nb = max(1, _TARGET_STEP_BYTES // per_step)
        nb = min(nb, N)
        if N >= 2:
            # Keep >= 2 grid steps along the parallel batch axis so both v7x
            # TensorCores stream HBM (near-zero cost on single-TC v5e/v6e).
            nb = min(nb, pl.cdiv(N, 2))
        nb = min(nb, max(1, _VMEM_BUDGET // (2 * per_step)))  # double-buffered
        return max(1, int(nb))

    if HW % 128 == 0:
        # ---- Dense path: (N, C, R, 128) blocks of (NB, C, RB, 128). ----
        R = HW // 128
        row_bytes = (C + 1) * 128 * elt
        max_rows = max(8, ((_VMEM_BUDGET // (2 * row_bytes)) // 8) * 8)
        if R <= max_rows:
            rb = R                      # full spatial extent per image
            nb = pick_nb((C + 1) * rb * 128)
        else:
            rb = max_rows               # multiple of 8 -> legal sublane tiling
            nb = 1
        grid = (pl.cdiv(N, nb), pl.cdiv(R, rb))

        x4 = x_nchw.reshape(N, C, R, 128)   # free reshape, no HBM transpose
        out = pl.pallas_call(
            _conv1x1_kernel_4d,
            out_shape=jax.ShapeDtypeStruct((N, 1, R, 128), dtype),
            grid_spec=pltpu.PrefetchScalarGridSpec(
                num_scalar_prefetch=0,
                grid=grid,
                in_specs=[
                    pl.BlockSpec((nb, C, rb, 128), lambda n, r: (n, 0, r, 0)),
                    pl.BlockSpec(memory_space=pltpu.MemorySpace.SMEM),
                    pl.BlockSpec(memory_space=pltpu.MemorySpace.SMEM),
                ],
                out_specs=pl.BlockSpec((nb, 1, rb, 128),
                                       lambda n, r: (n, 0, r, 0)),
            ),
            compiler_params=cparams,
            cost_estimate=cost,
        )(x4, w1d, b1d)
        return out.reshape(N, 1, H, W)

    # ---- Fallback path: flat (N, C, HW), lane-tiled along HW. ----
    hw_pad = pl.cdiv(HW, 128) * 128
    tm = min(8192, hw_pad)
    nb = pick_nb((C + 1) * tm)
    grid = (pl.cdiv(N, nb), pl.cdiv(HW, tm))

    x3 = x_nchw.reshape(N, C, HW)
    out = pl.pallas_call(
        _conv1x1_kernel_3d,
        out_shape=jax.ShapeDtypeStruct((N, 1, HW), dtype),
        grid_spec=pltpu.PrefetchScalarGridSpec(
            num_scalar_prefetch=0,
            grid=grid,
            in_specs=[
                pl.BlockSpec((nb, C, tm), lambda n, i: (n, 0, i)),
                pl.BlockSpec(memory_space=pltpu.MemorySpace.SMEM),
                pl.BlockSpec(memory_space=pltpu.MemorySpace.SMEM),
            ],
            out_specs=pl.BlockSpec((nb, 1, tm), lambda n, i: (n, 0, i)),
        ),
        compiler_params=cparams,
        cost_estimate=cost,
    )(x3, w1d, b1d)
    return out.reshape(N, 1, H, W)


def reference_conv1x1(x_nchw, weight, bias):
    # Pure-JAX reference (matches torch.nn.Conv2d with k=1, s=1, p=0).
    w = weight.reshape(1, -1)  # (1, C)
    return jnp.einsum("oc,nchw->nohw", w, x_nchw) + bias.reshape(1, 1, 1, 1)


if __name__ == "__main__":
    key = jax.random.PRNGKey(0)
    k_x1, k_x2, k_x3, k_w, k_b = jax.random.split(key, 5)

    # Conv2d(3, 1, kernel_size=1) parameters (deterministic init).
    C = 3
    fan_in = C * 1 * 1
    bound = 1.0 / (fan_in ** 0.5)
    weight = jax.random.uniform(k_w, (1, C, 1, 1), jnp.float32, -bound, bound)
    bias = jax.random.uniform(k_b, (1,), jnp.float32, -bound, bound)

    # 1) Small shape consistent with the module: batch=2, 3 channels, 16x16.
    x1 = jax.random.normal(k_x1, (2, C, 16, 16), dtype=jnp.float32)
    o1 = jax.block_until_ready(conv1x1(x1, weight, bias))
    r1 = reference_conv1x1(x1, weight, bias)
    assert o1.shape == (2, 1, 16, 16), o1.shape
    assert jnp.allclose(o1, r1, atol=1e-5, rtol=1e-5), "mismatch (16x16)"

    # 2) SVHN-like 32x32 with an odd batch -> partial batch block + masking.
    x2 = jax.random.normal(k_x2, (5, C, 32, 32), dtype=jnp.float32)
    o2 = jax.block_until_ready(conv1x1(x2, weight, bias))
    r2 = reference_conv1x1(x2, weight, bias)
    assert jnp.allclose(o2, r2, atol=1e-5, rtol=1e-5), "mismatch (32x32)"

    # 3) Spatial size not a multiple of 128 -> exercises the flat fallback.
    x3 = jax.random.normal(k_x3, (2, C, 12, 12), dtype=jnp.float32)
    o3 = jax.block_until_ready(conv1x1(x3, weight, bias))
    r3 = reference_conv1x1(x3, weight, bias)
    assert jnp.allclose(o3, r3, atol=1e-5, rtol=1e-5), "mismatch (12x12)"

    print("KERNEL_OK")
</pallas_src>

<mosaic_0001>
module attributes {stable_mosaic.version = 11 : i64} {
  func.func @_conv1x1_kernel_4d(%arg0: i32, %arg1: i32, %arg2: memref<1x3x2x128xf32, #tpu.memory_space<vmem>>, %arg3: memref<3xf32, #tpu.memory_space<smem>>, %arg4: memref<1xf32, #tpu.memory_space<smem>>, %arg5: memref<1x1x2x128xf32, #tpu.memory_space<vmem>>) attributes {dimension_semantics = [#tpu.dimension_semantics<parallel>, #tpu.dimension_semantics<parallel>], iteration_bounds = array<i64: 2, 1>, scalar_prefetch = 0 : i64, scratch_operands = 0 : i64, tpu.core_type = #tpu.core_type<tc>, window_params = [{transform_indices = @transform_0, window_bounds = array<i64: 1, 3, 2, 128>}, {transform_indices = @transform_1, window_bounds = array<i64: 3>}, {transform_indices = @transform_2, window_bounds = array<i64: 1>}, {transform_indices = @transform_3, window_bounds = array<i64: 1, 1, 2, 128>}]} {
    %c0 = arith.constant 0 : index
    %c0_0 = arith.constant 0 : index
    %c0_1 = arith.constant 0 : index
    %c0_2 = arith.constant 0 : index
    %0 = vector.load %arg2[%c0, %c0_0, %c0_1, %c0_2] : memref<1x3x2x128xf32, #tpu.memory_space<vmem>>, vector<1x1x2x128xf32>
    %c0_3 = arith.constant 0 : index
    %1 = memref.load %arg3[%c0_3] : memref<3xf32, #tpu.memory_space<smem>>
    %2 = vector.broadcast %1 : f32 to vector<1x1x2x128xf32>
    %3 = arith.mulf %0, %2 : vector<1x1x2x128xf32>
    %c0_4 = arith.constant 0 : index
    %4 = memref.load %arg4[%c0_4] : memref<1xf32, #tpu.memory_space<smem>>
    %5 = vector.broadcast %4 : f32 to vector<1x1x2x128xf32>
    %6 = arith.addf %3, %5 : vector<1x1x2x128xf32>
    %c0_5 = arith.constant 0 : index
    %c1 = arith.constant 1 : index
    %c0_6 = arith.constant 0 : index
    %c0_7 = arith.constant 0 : index
    %7 = vector.load %arg2[%c0_5, %c1, %c0_6, %c0_7] : memref<1x3x2x128xf32, #tpu.memory_space<vmem>>, vector<1x1x2x128xf32>
    %c1_8 = arith.constant 1 : index
    %8 = memref.load %arg3[%c1_8] : memref<3xf32, #tpu.memory_space<smem>>
    %9 = vector.broadcast %8 : f32 to vector<1x1x2x128xf32>
    %10 = arith.mulf %7, %9 : vector<1x1x2x128xf32>
    %11 = arith.addf %6, %10 : vector<1x1x2x128xf32>
    %c0_9 = arith.constant 0 : index
    %c2 = arith.constant 2 : index
    %c0_10 = arith.constant 0 : index
    %c0_11 = arith.constant 0 : index
    %12 = vector.load %arg2[%c0_9, %c2, %c0_10, %c0_11] : memref<1x3x2x128xf32, #tpu.memory_space<vmem>>, vector<1x1x2x128xf32>
    %c2_12 = arith.constant 2 : index
    %13 = memref.load %arg3[%c2_12] : memref<3xf32, #tpu.memory_space<smem>>
    %14 = vector.broadcast %13 : f32 to vector<1x1x2x128xf32>
    %15 = arith.mulf %12, %14 : vector<1x1x2x128xf32>
    %16 = arith.addf %11, %15 : vector<1x1x2x128xf32>
    %c0_13 = arith.constant 0 : index
    %c0_14 = arith.constant 0 : index
    %c0_15 = arith.constant 0 : index
    %c0_16 = arith.constant 0 : index
    %17 = vector.load %arg5[%c0_13, %c0_14, %c0_15, %c0_16] : memref<1x1x2x128xf32, #tpu.memory_space<vmem>>, vector<1x1x2x128xf32>
    tpu.vector_store %arg5[%c0_13, %c0_14, %c0_15, %c0_16], %16 {strides = array<i32>} : memref<1x1x2x128xf32, #tpu.memory_space<vmem>>, vector<1x1x2x128xf32>,
    return
  }
  func.func @transform_0(%arg0: i32, %arg1: i32) -> (i32, i32, i32, i32) {
    %c0_i32 = arith.constant 0 : i32
    %c0_i32_0 = arith.constant 0 : i32
    %c0_i32_1 = arith.constant 0 : i32
    return %arg0, %c0_i32, %arg1, %c0_i32_0 : i32, i32, i32, i32
  }
  func.func @transform_1(%arg0: i32, %arg1: i32) -> i32 {
    %c0_i32 = arith.constant 0 : i32
    %c0_i32_0 = arith.constant 0 : i32
    return %c0_i32 : i32
  }
  func.func @transform_2(%arg0: i32, %arg1: i32) -> i32 {
    %c0_i32 = arith.constant 0 : i32
    %c0_i32_0 = arith.constant 0 : i32
    return %c0_i32 : i32
  }
  func.func @transform_3(%arg0: i32, %arg1: i32) -> (i32, i32, i32, i32) {
    %c0_i32 = arith.constant 0 : i32
    %c0_i32_0 = arith.constant 0 : i32
    %c0_i32_1 = arith.constant 0 : i32
    return %arg0, %c0_i32, %arg1, %c0_i32_0 : i32, i32, i32, i32
  }
}

</mosaic_0001>

<bundles_post_ra>
// kernel: tpu_custom_call.1
= control target key start
LH: loop header
LB: loop body
LE: loop exit
PB: predicated region body
PF: predicated region fallthrough
CT: control target
= control target key end

     0   :  { %s759_s0 = inlined_call_operand.hbm [shape: f32[2,3,2,128], index: 0, kind: input, shape index: {}]   ;;  %s760_s1 = inlined_call_operand.vmem [shape: f32[3], index: 1, kind: input, shape index: {}]   ;;  %s761_s2 = inlined_call_operand.<no memory space> [shape: f32[1], index: 2, kind: input, shape index: {}]   ;;  %s762_s3 = inlined_call_operand.hbm [shape: f32[2,1,2,128], index: 3, kind: output, shape index: {}]  }
   0x1   :  { %8 = sst [smem:[#allocation2]] %s761_s2 }
   0x2   :  { %9 = vsyncpa [#allocation4], 0 }
   0x3   :  { %11 = vsyncpa [#allocation4 + $0x1], 0 }
   0x4   :  { %12 = vsyncpa [#allocation6], 0 }
   0x5   :  { %13 = vsyncpa [#allocation5], 0 }
   0x6   :  { %15 = vsyncpa [#allocation5 + $0x1], 0  ;;  %s607_s14 = smov 0   ;;  %s609_s15 = smov 0  }
   0x7   :  { %s611_s16 = smov 0   ;;  %s613_s17 = smov 0  }
   0x8   :  { %s615_s18 = smov 0   ;;  %s617_s19 = smov 0  }
   0x9 LB: > { %s353_s2 = sadd.s32 4294967295, %s579_s19   ;;  %s354_s20 = sadd.s32 4294967294, %s579_s19   ;;  %s579_s19 = sphi %s617_s19, %s21_s19   ;;  %s575_s18 = sphi %s615_s18, %s774_s18   ;;  %s571_s17 = sphi %s613_s17, %s773_s17   ;;  %s567_s16 = sphi %s611_s16, %s772_s16   ;;  %s563_s15 = sphi %s609_s15, %s771_s15   ;;  %s559_s14 = sphi %s607_s14, %s770_s14  }
   0xa   : > { %s42_s21 = sadd.s32 1, %s567_s16  ;;  %p49_p0 = scmp.ne.s32.totalorder %s567_s16, %s563_s15 }
   0xb   : > { %p50_p1 = scmp.eq.s32.totalorder %s579_s19, 0  ;;  %p55_p2 = scmp.ne.s32.totalorder %s563_s15, %s559_s14 }
   0xc   : > { %p645_p3 = scmp.eq.s32.totalorder %s353_s2, 0  ;;  %p123_p4 = scmp.eq.s32.totalorder %s353_s2, 1 }
   0xd   : > { %p649_p5 = por %p50_p1, %p49_p0  ;;  %p129_p6 = scmp.eq.s32.totalorder %s354_s20, 1 }
   0xe   : > { %p655_p7 = por %p645_p3, %p55_p2  ;;  %p659_p8 = por %p123_p4, %p49_p0 }
   0xf   : > { %p663_p9 = por %p129_p6, %p55_p2  ;;  %p355_p10 = scmp.ge.s32.totalorder %s579_s19, 1 }
  0x10   : > { %p136_p11 = scmp.lt.s32.totalorder %s579_s19, 3  ;;  %s148_s29 = sshll.u32 %s760_s1, 4  ;;  %s149_s29 = int_to_ptr.vmem [resolvable:$true] %s148_s29 }
  0x11   : > { %p357_p13 = scmp.ge.s32.totalorder %s579_s19, 2  ;;  %p394_p0 = scmp.lt.s32.totalorder %s579_s19, 2 }
  0x12   : > { %p672_p12 = pnand %p355_p10, %p136_p11  ;;  %s33_s5 = sadd.s32 1, %s575_s18 }
  0x13   : > { %p682_p2 = pnand %p394_p0, %p649_p5  ;;  %p35_p6 = scmp.ge.s32.totalorder %s33_s5, 2 }
  0x14   : > { %p381_p1 = pneg %p672_p12  ;;  %s162_s6 = sand.u32 1, %s567_s16  }
  0x15   : > { %s581_s7 = smov [#allocation7]   ;;  %s776_s5 = smov (%p35_p6, %s33_s5), 0 }
  0x16   : > { %p382_p4 = pnand %p381_p1, %p645_p3  ;;  %s370_s8 = smul.u32 6, %s162_s6 }
  0x17   : > { %s37_s9 = ssub.s32 %s575_s18, %s776_s5  ;;  %s371_s10 = smul.u32 6, %s575_s18 }
  0x18   : > { %384 = dma.vmem_to_smem (!%p382_p4), %s149_s29, 16, %s581_s7, [#allocation6]  }
  0x19   : > { %p40_p10 = scmp.eq.s32.totalorder %s37_s9, 0  ;;  %s172_s13 = scalar_lea.hbm %s759_s0, %s371_s10 }
  0x1a   : > { %s166_s2 = scalar_lea.vmem [#allocation3], %s370_s8  ;;  %s173_s27 = sshll.u32 %s172_s13, 4  ;;  %s174_s27 = int_to_ptr.hbm [resolvable:$true] %s173_s27 }
  0x1b   : > { %s175_s20 = sshll.u32 %s166_s2, 4  ;;  %s163_s28 = scalar_lea.sflag [#allocation4], %s162_s6  ;;  %s176_s20 = int_to_ptr.vmem [resolvable:$true] %s175_s20 }
  0x1c   : > { %s701_s23 = scalar_select %p40_p10, %s567_s16, %s42_s21  }
  0x1d   : > { %s582_s29 = smov 32   ;;  %s583_s7 = smov 2  }
  0x1e   : > { %388 = dma.hbm_to_vmem [thread:$0]  (!%p682_p2), %s174_s27, 96, %s176_s20, %s163_s28, %s582_s29, %s582_s29, %s583_s7  }
  0x1f   : > { %187 = sbr.rel (%p672_p12) target bundleno = 59 (0x3b), region = 32  ;;  %s708_s9 = sand.u32 (!%p672_p12), 1, %s563_s15  }
  0x20   : > { %s372_s8 = smul.u32 (!%p672_p12), 6, %s708_s9  ;;  %s190_s21 = scalar_lea.sflag (!%p672_p12), [#allocation4], %s708_s9 }
  0x22   : > { %s193_s10 = scalar_lea.vmem (!%p672_p12), [#allocation3], %s372_s8 }
  0x24   : > { %546 = dma.done.wait (%p655_p7), %s190_s21, 96  }
  0x25   : > { %548 = vsyncadd (%p655_p7), %s190_s21, 4294967200 }
  0x26   : > { %550 = dma.done.wait (%p645_p3), [#allocation6], 16  }
  0x27   : > { %552 = vsyncadd (%p645_p3), [#allocation6], 4294967280 }
  0x28   : > { %204 = sfence }
  0x29   : > { %s224_s30 = sld [smem:[#allocation7]]  ;;  %s361_s11 = sshll.u32 %s708_s9, 1  ;;  %v223_v0 = vld [vmem:[%s193_s10] sm:$0x3]  ;;  %v362_v2 = vld [vmem:[%s193_s10 + $0x2] sm:$0x3] }
  0x2a   : > { %s227_s4 = sld [smem:[#allocation2]]  ;;  %s367_s13 = sshll.u32 %s571_s17, 1  ;;  %v364_v5 = vld [vmem:[%s193_s10 + $0x4] sm:$0x3] }
  0x2b   : > { %s363_s6 = sld [smem:[#allocation7 + $0x1]]  ;;  %s255_s22 = scalar_lea.hbm %s762_s3, %s367_s13 }
  0x2c   : > { %s365_s12 = sld [smem:[#allocation7 + $0x2]]  ;;  %s222_s20 = scalar_lea.vmem [#allocation8], %s361_s11 }
  0x2d   : > { %s257_s27 = sshll.u32 %s222_s20, 4  ;;  %s259_s28 = sshll.u32 %s255_s22, 4  ;;  %s258_s27 = int_to_ptr.vmem [resolvable:$true] %s257_s27  ;;  %s260_s28 = int_to_ptr.hbm [resolvable:$true] %s259_s28 }
  0x2e   : > { %s244_s17 = scalar_lea.sflag [#allocation5], %s708_s9  ;;  %s507_s29 = sshra.s32 %s260_s28, 4  ;;  %s508_s29 = int_to_ptr.hbm [resolvable:$true] %s507_s29 }
  0x2f   : > { %v225_v1 = vstv %s224_s30  ;;  %s509_s7 = scalar_lea.hbm %s508_s29, 2  ;;  %s513_s10 = scalar_lea.hbm %s762_s3, 4 }
  0x30   : > { %v226_v3 = vmul.f32 %v225_v1, %v223_v0  ;;  %v228_v4 = vstv %s227_s4  ;;  %p510_p3 = scmp.ne.s32.totalorder %s508_s29, %s509_s7  ;;  %p514_p11 = scmp.lt.s32.totalorder %s508_s29, %s762_s3 }
  0x31   : > { %v233_v6 = vstv %s363_s6  ;;  %p515_p12 = scmp.lt.s32.totalorder %s513_s10, %s509_s7 }
  0x32   : > { %v229_v7 = vadd.f32 %v228_v4, %v226_v3  ;;  %v234_v8 = vmul.f32 %v362_v2, %v233_v6  ;;  %v239_v9 = vstv %s365_s12  ;;  %p511_p5 = pnand %p510_p3, %p659_p8 }
  0x33   : > { %v240_v10 = vmul.f32 %v364_v5, %v239_v9  ;;  %p516_p0 = por %p515_p12, %p514_p11 }
  0x34   : > { %v235_v11 = vadd.f32 %v234_v8, %v229_v7  ;;  %p512_p7 = pneg %p511_p5 }
  0x36   : > { %v241_v12 = vadd.f32 %v240_v10, %v235_v11  ;;  %p517_p1 = pnand %p516_p0, %p512_p7 }
  0x38   : > { %242 = vst [vmem:[%s222_s20] sm:$0x3] %v241_v12 }
  0x39   : > { %520 = shalt.err (!%p517_p1)
}
  0x3a   : > { %379 = dma.vmem_to_hbm [thread:$0]  (%p659_p8), %s258_s27, 32, %s260_s28, %s244_s17  }
  0x3b PF: > { %s271_s9 = sand.u32 1, %s559_s14   ;;  %p390_p2 = pnand %p357_p13, %p663_p9 }
  0x3c   : > { %s272_s6 = scalar_lea.sflag [#allocation5], %s271_s9 }
  0x3d   : > { %p391_p4 = pneg %p390_p2 }
  0x3f   : > { %554 = dma.done.wait (%p391_p4), %s272_s6, 32  }
  0x40   : > { %556 = vsyncadd (%p391_p4), %s272_s6, 4294967264  ;;  %s21_s19 = sadd.s32 1, %s579_s19   ;;  %s770_s14 = smov %s563_s15 }
  0x41   : > { %p18_p6 = scmp.ge.s32.totalorder %s21_s19, 4   ;;  %s771_s15 = smov %s567_s16 }
  0x42   : > { %s772_s16 = smov %s701_s23  ;;  %s773_s17 = smov %s575_s18 }
  0x43   : > { %s774_s18 = smov %s776_s5  ;;  %20 = sbr.rel (!%p18_p6) target bundleno = 9 (0x9), region = 84 }
  0x48   :  { %278 = vsyncpa [#allocation4], 1 }
  0x49   :  { %280 = vsyncpa [#allocation4 + $0x1], 1 }
  0x4a   :  { %281 = vsyncpa [#allocation5], 1 }
  0x4b   :  { %283 = vsyncpa [#allocation5 + $0x1], 1 }
  0x4c   :  { %284 = vsyncpa [#allocation6], 1 }
  0x4d   :  { %286 = vsyncpa [#allocation6 + $0x1], 1 }

</bundles_post_ra>
